<compile_context>
chip_gen: v6e
topology: v6e:2x2x1
jax: 0.10.0
libtpu: 0.0.40
codegen_flags: <defaults>
</compile_context>

<pallas_src>
import jax
import jax.numpy as jnp
from jax.experimental import pallas as pl
from jax.experimental.pallas import tpu as pltpu

LAMBDA_AUX = 0.3
LAMBDA_CONTRASTIVE = 0.1
LAMBDA_SPATIAL = 0.05


def _round_up(x, m):
    return ((x + m - 1) // m) * m


def _tpu_vmem_capacity_bytes():
    try:
        return int(pltpu.get_tpu_info().vmem_capacity_bytes)
    except Exception:
        # Conservative fallback (v7x-sized VMEM); only affects tiling choices.
        return 64 * 1024 * 1024


def _make_loss_kernel(B, TB, accumulate):
    """Kernel over one batch tile: emits CE / BCE / MSE partial sums."""

    def kernel(tgt_ref, logits_ref, aux_ref, elem_ref, attn_ref, spat_ref,
               out_ref):
        blk = pl.program_id(0)
        # row-validity mask: the last (ragged) block reads unspecified rows,
        # every reduced quantity below is routed through a where(valid, ...)
        row_ids = blk * TB + jax.lax.broadcasted_iota(jnp.int32, (TB, 1), 0)
        valid = row_ids < B                                    # (TB, 1) bool

        # ---- main_loss partial: softmax cross-entropy row sums ----
        logits = logits_ref[...]                               # native dtype
        C = logits.shape[-1]
        tgt = tgt_ref[...]                                     # (TB, 1) int32
        col = jax.lax.broadcasted_iota(jnp.int32, (TB, C), 1)
        # single nonzero per row -> exact in bf16; max is exact in bf16
        tgt_logit = jnp.sum(jnp.where(col == tgt, logits, 0.0),
                            axis=-1, keepdims=True).astype(jnp.float32)
        m = jnp.max(logits, axis=-1, keepdims=True).astype(jnp.float32)
        p = jnp.exp(logits.astype(jnp.float32) - m)            # f32 pass only
        lse = m + jnp.log(jnp.sum(p, axis=-1, keepdims=True))
        ce_sum = jnp.sum(jnp.where(valid, lse - tgt_logit, 0.0))

        # ---- aux_loss partial: BCE-with-logits element sums ----
        x = aux_ref[...].astype(jnp.float32)
        y = elem_ref[...].astype(jnp.float32)
        # stable: max(x,0) - x*y + log1p(exp(-|x|))
        bce = jnp.maximum(x, 0.0) - x * y + jnp.log1p(jnp.exp(-jnp.abs(x)))
        bce_row = jnp.sum(bce, axis=-1, keepdims=True)         # (TB, 1)
        bce_sum = jnp.sum(jnp.where(valid, bce_row, 0.0))

        # ---- spatial_loss partial: squared-error element sums ----
        d = attn_ref[...].astype(jnp.float32) - spat_ref[...].astype(jnp.float32)
        mse_row = jnp.sum(d * d, axis=-1, keepdims=True)       # (TB, 1)
        mse_sum = jnp.sum(jnp.where(valid, mse_row, 0.0))

        # lane/sublane-dense partial-sum tile: row 0, lanes {0,1,2}
        sub = jax.lax.broadcasted_iota(jnp.int32, (8, 128), 0)
        lane = jax.lax.broadcasted_iota(jnp.int32, (8, 128), 1)
        r0 = sub == 0
        tile = jnp.where(
            r0 & (lane == 0), ce_sum,
            jnp.where(r0 & (lane == 1), bce_sum,
                      jnp.where(r0 & (lane == 2), mse_sum, 0.0)))

        if accumulate:
            # single resident accumulator (single-TC chips)
            @pl.when(blk == 0)
            def _():
                out_ref[...] = jnp.zeros_like(out_ref)
            out_ref[...] += tile
        else:
            # per-block partials (v7x: batch axis sharded across 2 TCs)
            out_ref[...] = tile

    return kernel


def _choose_tiling(B, row_bytes, tmp_row_bytes, vmem_cap, multi_tc):
    # ~70% of physical VMEM: ~90 MiB on v5e/v6e (128 MiB), ~44 MiB on v7x (64 MiB)
    budget = int(vmem_cap * 0.7)
    # 2x double-buffered input tiles + f32 CE/BCE/MSE temporaries per row
    per_row = 2 * row_bytes + tmp_row_bytes
    tb = max(8, budget // max(1, per_row))
    tb = min(tb, max(8, (B // 8) * 8))           # no point exceeding the batch
    if multi_tc and B >= 16:
        # v7x: ensure the "parallel" grid spans both TensorCores
        tb = min(tb, max(8, _round_up(pl.cdiv(B, 2), 8)))
    tb = max(8, (tb // 8) * 8)
    return int(tb)


def _vmem_limit_bytes(TB, row_bytes, tmp_row_bytes, vmem_cap):
    need = 2 * TB * row_bytes + TB * tmp_row_bytes + 4 * 2**20
    hard_cap = max(16 * 2**20, vmem_cap - 16 * 2**20)   # ~48 MiB ceiling on v7x
    return int(min(hard_cap, max(16 * 2**20, need)))


def _pallas_loss_sums(tgt_col, logits, aux, elem, attn, spat, B, TB,
                      accumulate, vmem_limit):
    """Returns (sum_ce, sum_bce, sum_mse) as f32 scalars."""
    C = logits.shape[-1]
    A = aux.shape[-1]
    S = attn.shape[-1]
    nblk = pl.cdiv(B, TB)     # ragged last block handled by in-kernel mask

    kernel = _make_loss_kernel(B, TB, accumulate)

    in_specs = [
        pl.BlockSpec((TB, 1), lambda i: (i, 0)),   # int32 targets column
        pl.BlockSpec((TB, C), lambda i: (i, 0)),   # logits
        pl.BlockSpec((TB, A), lambda i: (i, 0)),   # aux predictions
        pl.BlockSpec((TB, A), lambda i: (i, 0)),   # element targets
        pl.BlockSpec((TB, S), lambda i: (i, 0)),   # attention weights
        pl.BlockSpec((TB, S), lambda i: (i, 0)),   # spatial targets
    ]
    if accumulate:
        out_shape = jax.ShapeDtypeStruct((8, 128), jnp.float32)
        out_specs = pl.BlockSpec((8, 128), lambda i: (0, 0))
        semantics = ("arbitrary",)
        out_bytes = 8 * 128 * 4
    else:
        out_shape = jax.ShapeDtypeStruct((nblk * 8, 128), jnp.float32)
        out_specs = pl.BlockSpec((8, 128), lambda i: (i, 0))
        semantics = ("parallel",)
        out_bytes = nblk * 8 * 128 * 4

    grid_spec = pltpu.PrefetchScalarGridSpec(
        num_scalar_prefetch=0,
        grid=(nblk,),
        in_specs=in_specs,
        out_specs=out_specs,
    )

    in_bytes = sum(int(a.size) * a.dtype.itemsize
                   for a in (tgt_col, logits, aux, elem, attn, spat))
    cost = pl.CostEstimate(
        flops=int(B * (5 * C + 8 * A + 3 * S)),
        transcendentals=int(B * (C + 1 + 2 * A)),
        bytes_accessed=int(in_bytes + out_bytes),
    )

    out = pl.pallas_call(
        kernel,
        out_shape=out_shape,
        grid_spec=grid_spec,
        compiler_params=pltpu.CompilerParams(
            dimension_semantics=semantics,
            vmem_limit_bytes=vmem_limit,
        ),
        cost_estimate=cost,
    )(tgt_col, logits, aux, elem, attn, spat)

    if accumulate:
        totals = out[0]                      # (128,), unused lanes are 0
    else:
        totals = jnp.sum(out, axis=0)        # (128,), unused lanes are 0
    return totals[0], totals[1], totals[2]


def multimodal_loss(outputs, targets,
                    lambda_aux=LAMBDA_AUX,
                    lambda_contrastive=LAMBDA_CONTRASTIVE,
                    lambda_spatial=LAMBDA_SPATIAL):
    """Mirrors MultimodalLossFunction.forward (fully-populated dict case)."""
    # TODO(synk): the PyTorch module also supports partially-populated dicts;
    # that static key-dispatch is Python glue and is not covered by this
    # fused fully-populated-path kernel.
    logits = outputs['main_logits']
    aux = outputs['aux_predictions']
    attn = outputs['attention_weights']
    elem = targets['element_targets']
    spat = targets['spatial_targets']
    tgt_col = targets['main_targets'].astype(jnp.int32).reshape(-1, 1)

    B, C = logits.shape
    A = aux.shape[-1]
    S = attn.shape[-1]

    row_bytes = (C * logits.dtype.itemsize + 4
                 + A * (aux.dtype.itemsize + elem.dtype.itemsize)
                 + S * (attn.dtype.itemsize + spat.dtype.itemsize))
    # f32 CE-path temporaries (~4x (TB,C) f32) + aux/spatial f32 temps
    tmp_row_bytes = 4 * C * 4 + 2 * (A + S) * 4

    vmem_cap = _tpu_vmem_capacity_bytes()
    multi_tc = vmem_cap <= 96 * 2**20        # v7x-like: 64 MiB VMEM, 2 TCs
    accumulate = not multi_tc                # single-TC: resident accumulator
    TB = _choose_tiling(B, row_bytes, tmp_row_bytes, vmem_cap, multi_tc)
    vmem_limit = _vmem_limit_bytes(TB, row_bytes, tmp_row_bytes, vmem_cap)

    # TODO(synk): for vocab-scale C (>= ~32-64k) add a class-dim grid axis
    # with a streaming (online) logsumexp instead of a single (TB, C) pass.
    ce_sum, bce_sum, mse_sum = _pallas_loss_sums(
        tgt_col, logits, aux, elem, attn, spat, B, TB, accumulate, vmem_limit)

    inv_b = 1.0 / float(B)
    losses = {
        'main_loss': ce_sum * inv_b,
        'aux_loss': bce_sum * (inv_b / float(A)),
        'contrastive_loss': jnp.asarray(outputs['contrastive_loss'],
                                        jnp.float32),
        'spatial_loss': mse_sum * (inv_b / float(S)),
    }
    losses['total_loss'] = (losses['main_loss']
                            + lambda_aux * losses['aux_loss']
                            + lambda_contrastive * losses['contrastive_loss']
                            + lambda_spatial * losses['spatial_loss'])
    return losses


def _reference_losses(outputs, targets):
    """Pure-JAX reference for validation."""
    logits = outputs['main_logits'].astype(jnp.float32)
    lbl = targets['main_targets'].astype(jnp.int32)
    lse = jax.scipy.special.logsumexp(logits, axis=-1)
    ce = jnp.mean(lse - jnp.take_along_axis(logits, lbl[:, None], axis=-1)[:, 0])
    x = outputs['aux_predictions'].astype(jnp.float32)
    y = targets['element_targets'].astype(jnp.float32)
    bce = jnp.mean(jnp.maximum(x, 0.0) - x * y + jnp.log1p(jnp.exp(-jnp.abs(x))))
    d = (outputs['attention_weights'].astype(jnp.float32)
         - targets['spatial_targets'].astype(jnp.float32))
    mse = jnp.mean(d * d)
    contrast = jnp.asarray(outputs['contrastive_loss'], jnp.float32)
    total = (ce + LAMBDA_AUX * bce + LAMBDA_CONTRASTIVE * contrast
             + LAMBDA_SPATIAL * mse)
    return {'main_loss': ce, 'aux_loss': bce, 'contrastive_loss': contrast,
            'spatial_loss': mse, 'total_loss': total}


if __name__ == "__main__":
    key = jax.random.PRNGKey(0)
    # small shapes; B=12 deliberately not a multiple of the 8-row tile so the
    # ragged-last-block path (no wrapper padding, in-kernel mask) is exercised.
    B, C, A, S = 12, 32, 16, 64

    k = jax.random.split(key, 6)
    outputs = {
        'main_logits': jax.random.normal(k[0], (B, C), jnp.float32),
        'aux_predictions': jax.random.normal(k[1], (B, A), jnp.float32),
        'attention_weights': jax.random.uniform(k[2], (B, S), jnp.float32),
        'contrastive_loss': jnp.float32(0.42),
    }
    targets = {
        'main_targets': jax.random.randint(k[3], (B,), 0, C, jnp.int32),
        'element_targets': jax.random.bernoulli(k[4], 0.5, (B, A)).astype(jnp.float32),
        'spatial_targets': jax.random.uniform(k[5], (B, S), jnp.float32),
    }

    losses = jax.tree_util.tree_map(jax.block_until_ready,
                                    multimodal_loss(outputs, targets))
    ref = _reference_losses(outputs, targets)

    for name in ('main_loss', 'aux_loss', 'contrastive_loss',
                 'spatial_loss', 'total_loss'):
        assert jnp.allclose(losses[name], ref[name], rtol=1e-5, atol=1e-5), (
            name, losses[name], ref[name])

    print("KERNEL_OK")
</pallas_src>

<mosaic_0001>
module attributes {stable_mosaic.version = 11 : i64} {
  func.func @kernel(%arg0: i32, %arg1: memref<8x1xi32, #tpu.memory_space<vmem>>, %arg2: memref<8x32xf32, #tpu.memory_space<vmem>>, %arg3: memref<8x16xf32, #tpu.memory_space<vmem>>, %arg4: memref<8x16xf32, #tpu.memory_space<vmem>>, %arg5: memref<8x64xf32, #tpu.memory_space<vmem>>, %arg6: memref<8x64xf32, #tpu.memory_space<vmem>>, %arg7: memref<8x128xf32, #tpu.memory_space<vmem>>) attributes {dimension_semantics = [#tpu.dimension_semantics<parallel>], iteration_bounds = array<i64: 2>, scalar_prefetch = 0 : i64, scratch_operands = 0 : i64, tpu.core_type = #tpu.core_type<tc>, window_params = [{transform_indices = @transform_0, window_bounds = array<i64: 8, 1>}, {transform_indices = @transform_1, window_bounds = array<i64: 8, 32>}, {transform_indices = @transform_2, window_bounds = array<i64: 8, 16>}, {transform_indices = @transform_3, window_bounds = array<i64: 8, 16>}, {transform_indices = @transform_4, window_bounds = array<i64: 8, 64>}, {transform_indices = @transform_5, window_bounds = array<i64: 8, 64>}, {transform_indices = @transform_6, window_bounds = array<i64: 8, 128>}]} {
    %c8_i32 = arith.constant 8 : i32
    %0 = arith.muli %arg0, %c8_i32 : i32
    %1 = tpu.iota {dimensions = array<i32: 0>} : vector<8x1xi32>
    %2 = vector.broadcast %0 : i32 to vector<8x1xi32>
    %3 = arith.addi %2, %1 : vector<8x1xi32>
    %c12_i32 = arith.constant 12 : i32
    %4 = vector.broadcast %c12_i32 : i32 to vector<8x1xi32>
    %5 = arith.cmpi slt, %3, %4 : vector<8x1xi32>
    %c0 = arith.constant 0 : index
    %c0_0 = arith.constant 0 : index
    %6 = vector.load %arg2[%c0, %c0_0] : memref<8x32xf32, #tpu.memory_space<vmem>>, vector<8x32xf32>
    %c0_1 = arith.constant 0 : index
    %c0_2 = arith.constant 0 : index
    %7 = vector.load %arg1[%c0_1, %c0_2] : memref<8x1xi32, #tpu.memory_space<vmem>>, vector<8x1xi32>
    %8 = tpu.iota {dimensions = array<i32: 1>} : vector<8x32xi32>
    %9 = vector.broadcast %7 : vector<8x1xi32> to vector<8x32xi32>
    %10 = arith.cmpi eq, %8, %9 : vector<8x32xi32>
    %cst = arith.constant 0.000000e+00 : f32
    %11 = vector.broadcast %cst : f32 to vector<8x32xf32>
    %12 = arith.select %10, %6, %11 : vector<8x32xi1>, vector<8x32xf32>
    %cst_3 = arith.constant dense<0.000000e+00> : vector<8xf32>
    %13 = vector.multi_reduction <add>, %12, %cst_3 [1] : vector<8x32xf32> to vector<8xf32>
    %14 = vector.shape_cast %13 : vector<8xf32> to vector<8x1xf32>
    %cst_4 = arith.constant dense<0xFF800000> : vector<8xf32>
    %15 = vector.multi_reduction <maximumf>, %6, %cst_4 [1] : vector<8x32xf32> to vector<8xf32>
    %16 = vector.shape_cast %15 : vector<8xf32> to vector<8x1xf32>
    %17 = vector.broadcast %16 : vector<8x1xf32> to vector<8x32xf32>
    %18 = arith.subf %6, %17 : vector<8x32xf32>
    %19 = math.exp %18 : vector<8x32xf32>
    %cst_5 = arith.constant dense<0.000000e+00> : vector<8xf32>
    %20 = vector.multi_reduction <add>, %19, %cst_5 [1] : vector<8x32xf32> to vector<8xf32>
    %21 = vector.shape_cast %20 : vector<8xf32> to vector<8x1xf32>
    %22 = math.log %21 : vector<8x1xf32>
    %23 = arith.addf %16, %22 : vector<8x1xf32>
    %24 = arith.subf %23, %14 : vector<8x1xf32>
    %cst_6 = arith.constant 0.000000e+00 : f32
    %25 = vector.broadcast %cst_6 : f32 to vector<8x1xf32>
    %26 = arith.select %5, %24, %25 : vector<8x1xi1>, vector<8x1xf32>
    %27 = vector.shape_cast %26 : vector<8x1xf32> to vector<1x8x1xf32>
    %cst_7 = arith.constant dense<0.000000e+00> : vector<1xf32>
    %28 = vector.multi_reduction <add>, %27, %cst_7 [1, 2] : vector<1x8x1xf32> to vector<1xf32>
    %29 = vector.shape_cast %28 : vector<1xf32> to vector<1x1x1xf32>
    %30 = vector.extract %29[0, 0, 0] : f32 from vector<1x1x1xf32>
    %c0_8 = arith.constant 0 : index
    %c0_9 = arith.constant 0 : index
    %31 = vector.load %arg3[%c0_8, %c0_9] : memref<8x16xf32, #tpu.memory_space<vmem>>, vector<8x16xf32>
    %c0_10 = arith.constant 0 : index
    %c0_11 = arith.constant 0 : index
    %32 = vector.load %arg4[%c0_10, %c0_11] : memref<8x16xf32, #tpu.memory_space<vmem>>, vector<8x16xf32>
    %cst_12 = arith.constant 0.000000e+00 : f32
    %33 = vector.broadcast %cst_12 : f32 to vector<8x16xf32>
    %34 = arith.maximumf %31, %33 : vector<8x16xf32>
    %35 = arith.mulf %31, %32 : vector<8x16xf32>
    %36 = arith.subf %34, %35 : vector<8x16xf32>
    %37 = math.absf %31 : vector<8x16xf32>
    %cst_13 = arith.constant 0.000000e+00 : f32
    %38 = vector.broadcast %cst_13 : f32 to vector<8x16xf32>
    %39 = arith.subf %38, %37 : vector<8x16xf32>
    %40 = math.exp %39 : vector<8x16xf32>
    %41 = math.log1p %40 : vector<8x16xf32>
    %42 = arith.addf %36, %41 : vector<8x16xf32>
    %cst_14 = arith.constant dense<0.000000e+00> : vector<8xf32>
    %43 = vector.multi_reduction <add>, %42, %cst_14 [1] : vector<8x16xf32> to vector<8xf32>
    %44 = vector.shape_cast %43 : vector<8xf32> to vector<8x1xf32>
    %cst_15 = arith.constant 0.000000e+00 : f32
    %45 = vector.broadcast %cst_15 : f32 to vector<8x1xf32>
    %46 = arith.select %5, %44, %45 : vector<8x1xi1>, vector<8x1xf32>
    %47 = vector.shape_cast %46 : vector<8x1xf32> to vector<1x8x1xf32>
    %cst_16 = arith.constant dense<0.000000e+00> : vector<1xf32>
    %48 = vector.multi_reduction <add>, %47, %cst_16 [1, 2] : vector<1x8x1xf32> to vector<1xf32>
    %49 = vector.shape_cast %48 : vector<1xf32> to vector<1x1x1xf32>
    %50 = vector.extract %49[0, 0, 0] : f32 from vector<1x1x1xf32>
    %c0_17 = arith.constant 0 : index
    %c0_18 = arith.constant 0 : index
    %51 = vector.load %arg5[%c0_17, %c0_18] : memref<8x64xf32, #tpu.memory_space<vmem>>, vector<8x64xf32>
    %c0_19 = arith.constant 0 : index
    %c0_20 = arith.constant 0 : index
    %52 = vector.load %arg6[%c0_19, %c0_20] : memref<8x64xf32, #tpu.memory_space<vmem>>, vector<8x64xf32>
    %53 = arith.subf %51, %52 : vector<8x64xf32>
    %54 = arith.mulf %53, %53 : vector<8x64xf32>
    %cst_21 = arith.constant dense<0.000000e+00> : vector<8xf32>
    %55 = vector.multi_reduction <add>, %54, %cst_21 [1] : vector<8x64xf32> to vector<8xf32>
    %56 = vector.shape_cast %55 : vector<8xf32> to vector<8x1xf32>
    %cst_22 = arith.constant 0.000000e+00 : f32
    %57 = vector.broadcast %cst_22 : f32 to vector<8x1xf32>
    %58 = arith.select %5, %56, %57 : vector<8x1xi1>, vector<8x1xf32>
    %59 = vector.shape_cast %58 : vector<8x1xf32> to vector<1x8x1xf32>
    %cst_23 = arith.constant dense<0.000000e+00> : vector<1xf32>
    %60 = vector.multi_reduction <add>, %59, %cst_23 [1, 2] : vector<1x8x1xf32> to vector<1xf32>
    %61 = vector.shape_cast %60 : vector<1xf32> to vector<1x1x1xf32>
    %62 = vector.extract %61[0, 0, 0] : f32 from vector<1x1x1xf32>
    %63 = tpu.iota {dimensions = array<i32: 0>} : vector<8x128xi32>
    %64 = tpu.iota {dimensions = array<i32: 1>} : vector<8x128xi32>
    %c0_i32 = arith.constant 0 : i32
    %65 = vector.broadcast %c0_i32 : i32 to vector<8x128xi32>
    %66 = arith.cmpi eq, %63, %65 : vector<8x128xi32>
    %c0_i32_24 = arith.constant 0 : i32
    %67 = vector.broadcast %c0_i32_24 : i32 to vector<8x128xi32>
    %68 = arith.cmpi eq, %64, %67 : vector<8x128xi32>
    %69 = arith.andi %66, %68 : vector<8x128xi1>
    %c1_i32 = arith.constant 1 : i32
    %70 = vector.broadcast %c1_i32 : i32 to vector<8x128xi32>
    %71 = arith.cmpi eq, %64, %70 : vector<8x128xi32>
    %72 = arith.andi %66, %71 : vector<8x128xi1>
    %c2_i32 = arith.constant 2 : i32
    %73 = vector.broadcast %c2_i32 : i32 to vector<8x128xi32>
    %74 = arith.cmpi eq, %64, %73 : vector<8x128xi32>
    %75 = arith.andi %66, %74 : vector<8x128xi1>
    %cst_25 = arith.constant 0.000000e+00 : f32
    %76 = vector.broadcast %62 : f32 to vector<8x128xf32>
    %77 = vector.broadcast %cst_25 : f32 to vector<8x128xf32>
    %78 = arith.select %75, %76, %77 : vector<8x128xi1>, vector<8x128xf32>
    %79 = vector.broadcast %50 : f32 to vector<8x128xf32>
    %80 = arith.select %72, %79, %78 : vector<8x128xi1>, vector<8x128xf32>
    %81 = vector.broadcast %30 : f32 to vector<8x128xf32>
    %82 = arith.select %69, %81, %80 : vector<8x128xi1>, vector<8x128xf32>
    %c0_26 = arith.constant 0 : index
    %c0_27 = arith.constant 0 : index
    %83 = vector.load %arg7[%c0_26, %c0_27] : memref<8x128xf32, #tpu.memory_space<vmem>>, vector<8x128xf32>
    tpu.vector_store %arg7[%c0_26, %c0_27], %82 {strides = array<i32>} : memref<8x128xf32, #tpu.memory_space<vmem>>, vector<8x128xf32>,
    return
  }
  func.func @transform_0(%arg0: i32) -> (i32, i32) {
    %c0_i32 = arith.constant 0 : i32
    %c0_i32_0 = arith.constant 0 : i32
    return %arg0, %c0_i32 : i32, i32
  }
  func.func @transform_1(%arg0: i32) -> (i32, i32) {
    %c0_i32 = arith.constant 0 : i32
    %c0_i32_0 = arith.constant 0 : i32
    return %arg0, %c0_i32 : i32, i32
  }
  func.func @transform_2(%arg0: i32) -> (i32, i32) {
    %c0_i32 = arith.constant 0 : i32
    %c0_i32_0 = arith.constant 0 : i32
    return %arg0, %c0_i32 : i32, i32
  }
  func.func @transform_3(%arg0: i32) -> (i32, i32) {
    %c0_i32 = arith.constant 0 : i32
    %c0_i32_0 = arith.constant 0 : i32
    return %arg0, %c0_i32 : i32, i32
  }
  func.func @transform_4(%arg0: i32) -> (i32, i32) {
    %c0_i32 = arith.constant 0 : i32
    %c0_i32_0 = arith.constant 0 : i32
    return %arg0, %c0_i32 : i32, i32
  }
  func.func @transform_5(%arg0: i32) -> (i32, i32) {
    %c0_i32 = arith.constant 0 : i32
    %c0_i32_0 = arith.constant 0 : i32
    return %arg0, %c0_i32 : i32, i32
  }
  func.func @transform_6(%arg0: i32) -> (i32, i32) {
    %c0_i32 = arith.constant 0 : i32
    %c0_i32_0 = arith.constant 0 : i32
    return %arg0, %c0_i32 : i32, i32
  }
}

</mosaic_0001>

<bundles_post_ra>
// kernel: tpu_custom_call.1
= control target key start
LH: loop header
LB: loop body
LE: loop exit
PB: predicated region body
PF: predicated region fallthrough
CT: control target
= control target key end

     0   :  { %s1289_s0 = inlined_call_operand.vmem [shape: s32[12,1], index: 0, kind: input, shape index: {}]   ;;  %s1290_s1 = inlined_call_operand.vmem [shape: f32[12,32], index: 1, kind: input, shape index: {}]   ;;  %s1291_s2 = inlined_call_operand.hbm [shape: f32[12,16], index: 2, kind: input, shape index: {}]   ;;  %s1292_s3 = inlined_call_operand.hbm [shape: f32[12,16], index: 3, kind: input, shape index: {}]   ;;  %s1293_s4 = inlined_call_operand.hbm [shape: f32[12,64], index: 4, kind: input, shape index: {}]   ;;  %s1294_s5 = inlined_call_operand.hbm [shape: f32[12,64], index: 5, kind: input, shape index: {}]   ;;  %s1295_s6 = inlined_call_operand.hbm [shape: f32[16,128], index: 6, kind: output, shape index: {}]  }
   0x1   :  { %1303 = sst [smem:[#allocation20_spill]] %s1291_s2 }
   0x2   :  { %1304 = sst [smem:[#allocation21_spill]] %s1292_s3 }
   0x3   :  { %11 = vsyncpa [#allocation3], 0 }
   0x4   :  { %13 = vsyncpa [#allocation3 + $0x1], 0 }
   0x5   :  { %14 = vsyncpa [#allocation6], 0 }
   0x6   :  { %16 = vsyncpa [#allocation6 + $0x1], 0 }
   0x7   :  { %17 = vsyncpa [#allocation9], 0 }
   0x8   :  { %19 = vsyncpa [#allocation9 + $0x1], 0 }
   0x9   :  { %20 = vsyncpa [#allocation4], 0 }
   0xa   :  { %22 = vsyncpa [#allocation4 + $0x1], 0  ;;  %s1022_s21 = smov 0   ;;  %s1024_s22 = smov 0  }
   0xb   :  { %s1026_s23 = smov 0   ;;  %s1028_s24 = smov 0  }
   0xc LB: > { %1305 = sst [smem:[#allocation15_spill]] %s975_s23  ;;  %s1043_s25 = sadd.s32 4294967295, %s979_s24   ;;  %s979_s24 = sphi %s1028_s24, %s1326_s24   ;;  %s975_s23 = sphi %s1026_s23, %s1328_s23   ;;  %s971_s22 = sphi %s1024_s22, %s1330_s22   ;;  %s967_s21 = sphi %s1022_s21, %s1329_s21  }
   0xd   : > { %1306 = sst [smem:[#allocation16_spill]] %s979_s24  ;;  %s694_s26 = sadd.s32 4294967294, %s979_s24  }
   0xe   : > { %s1047_s27 = sadd.s32 1, %s979_s24   ;;  %s87_s28 = sadd.s32 1, %s975_s23 }
   0xf   : > { %1307 = sst [smem:[#allocation17_spill]] %s1047_s27  ;;  %s84_s29 = ssub.s32 %s979_s24, %s1047_s27 }
  0x10   : > { %p94_p0 = scmp.ne.s32.totalorder %s975_s23, %s971_s22  ;;  %p85_p1 = scmp.eq.s32.totalorder %s84_s29, 0 }
  0x11   : > { %p95_p2 = scmp.eq.s32.totalorder %s979_s24, 0  ;;  %p100_p3 = scmp.ne.s32.totalorder %s971_s22, %s967_s21 }
  0x12   : > { %p101_p4 = scmp.eq.s32.totalorder %s1043_s25, 0  ;;  %p202_p7 = scmp.eq.s32.totalorder %s1043_s25, 1 }
  0x13   : > { %s1059_s30 = scalar_select %p85_p1, %s975_s23, %s87_s28  }
  0x14   : > { %p96_p5 = por %p95_p2, %p94_p0  ;;  %p1061_p6 = por %p101_p4, %p100_p3 }
  0x15   : > { %1308 = sst [smem:[#allocation18_spill]] %s1059_s30  ;;  %p208_p8 = scmp.eq.s32.totalorder %s694_s26, 1 }
  0x16   : > { %s1309_s7 = scalar_select %p1061_p6, 1, 0 }
  0x17   : > { %p751_p10 = scmp.lt.s32.totalorder %s979_s24, 2  ;;  %p1068_p11 = por %p202_p7, %p94_p0 }
  0x18   : > { %p1072_p12 = por %p208_p8, %p100_p3  ;;  %s1077_s10 = sand.u32 1, %s975_s23  }
  0x19   : > { %s1310_s8 = scalar_select %p1068_p11, 1, 0 }
  0x1a   : > { %s1311_s9 = scalar_select %p1072_p12, 1, 0 }
  0x1b   : > { %s1080_s11 = sshll.u32 %s979_s24, 7  ;;  %s1083_s12 = sshll.u32 %s1077_s10, 3 }
  0x1c   : > { %1312 = sst [smem:[#allocation19_spill]] %s1311_s9  ;;  %p1085_p13 = pnand %p751_p10, %p96_p5 }
  0x1d   : > { %s260_s14 = sand.u32 1, %s979_s24   ;;  %s1314_s3 = sld [smem:[#allocation21_spill]] }
  0x1e   : > { %s264_s18 = scalar_lea.vmem [#allocation5], %s1083_s12  ;;  %s1098_s20 = scalar_lea.sflag [#allocation6], %s260_s14 }
  0x1f   : > { %s271_s19 = sshll.u32 %s264_s18, 4  ;;  %p1104_p2 = pneg %p1085_p13  ;;  %s272_s19 = int_to_ptr.vmem [resolvable:$true] %s271_s19 }
  0x23   : > { %s1094_s17 = scalar_lea.hbm %s1314_s3, %s1080_s11  ;;  %s800_s16 = scalar_lea.hbm %s1314_s3, 256 }
  0x24   : > { %s795_s26 = scalar_lea.hbm %s1094_s17, 128  ;;  %p801_p5 = scmp.lt.s32.totalorder %s1094_s17, %s1314_s3 }
  0x25   : > { %p796_p1 = scmp.ne.s32.totalorder %s1094_s17, %s795_s26  ;;  %p802_p7 = scmp.lt.s32.totalorder %s800_s16, %s795_s26 }
  0x27   : > { %p798_p3 = pnand %p1104_p2, %p796_p1  ;;  %p803_p8 = por %p802_p7, %p801_p5 }
  0x29   : > { %p799_p4 = pneg %p798_p3 }
  0x2b   : > { %p804_p10 = pnand %p803_p8, %p799_p4 }
  0x2d   : > { %807 = shalt.err (!%p804_p10)
}
  0x2e   : > { %s808_s14 = scalar_lea.vmem %s272_s19, 128  ;;  %s981_s23 = smov [#allocation5]  }
  0x2f   : > { %p809_p9 = scmp.ne.s32.totalorder %s272_s19, %s808_s14  ;;  %s813_s27 = sshll.u32 %s981_s23, 4  ;;  %s814_s27 = int_to_ptr.vmem [resolvable:$false] %s813_s27 }
  0x30   : > { %s815_s9 = scalar_lea.vmem %s814_s27, 256  ;;  %p816_p1 = scmp.lt.s32.totalorder %s272_s19, %s814_s27 }
  0x31   : > { %p811_p0 = pnand %p809_p9, %p1104_p2  ;;  %p817_p3 = scmp.lt.s32.totalorder %s815_s9, %s808_s14 }
  0x33   : > { %p812_p12 = pneg %p811_p0  ;;  %p818_p11 = por %p817_p3, %p816_p1 }
  0x35   : > { %p819_p6 = pnand %p818_p11, %p812_p12 }
  0x37   : > { %822 = shalt.err (!%p819_p6)
}
  0x38   : > { %740 = dma.hbm_to_vmem [thread:$0]  (!%p1085_p13), %s1094_s17, 128, %s272_s19, %s1098_s20  }
  0x39   : > { %p312_p9 = scmp.lt.s32.totalorder %s979_s24, 3  ;;  %s1316_s2 = sld [smem:[#allocation20_spill]] }
  0x3a   : > { %p1317_p0 = scmp.ge.s32.totalorder %s979_s24, 1  ;;  %s246_s26 = scalar_lea.vmem [#allocation2], %s1083_s12 }
  0x3b   : > { %s253_s29 = sshll.u32 %s246_s26, 4  ;;  %s243_s15 = scalar_lea.sflag [#allocation3], %s1077_s10  ;;  %s254_s29 = int_to_ptr.vmem [resolvable:$true] %s253_s29 }
  0x3c   : > { %p1132_p6 = pnand %p1317_p0, %p312_p9 }
  0x3e   : > { %s1318_s9 = scalar_select %p1132_p6, 1, 0 }
  0x3f   : > { %s1128_s27 = scalar_lea.hbm %s1316_s2, %s1080_s11  ;;  %s828_s18 = scalar_lea.hbm %s1316_s2, 256 }
  0x40   : > { %s823_s16 = scalar_lea.hbm %s1128_s27, 128  ;;  %p829_p5 = scmp.lt.s32.totalorder %s1128_s27, %s1316_s2 }
  0x41   : > { %p824_p11 = scmp.ne.s32.totalorder %s1128_s27, %s823_s16  ;;  %p830_p7 = scmp.lt.s32.totalorder %s828_s18, %s823_s16 }
  0x43   : > { %p826_p12 = pnand %p824_p11, %p1104_p2  ;;  %p831_p8 = por %p830_p7, %p829_p5 }
  0x45   : > { %p827_p4 = pneg %p826_p12 }
  0x47   : > { %p832_p10 = pnand %p831_p8, %p827_p4 }
  0x49   : > { %835 = shalt.err (!%p832_p10)
}
  0x4a   : > { %s836_s30 = scalar_lea.vmem %s254_s29, 128  ;;  %s982_s26 = smov [#allocation2]  }
  0x4b   : > { %p837_p1 = scmp.ne.s32.totalorder %s254_s29, %s836_s30  ;;  %s841_s3 = sshll.u32 %s982_s26, 4  ;;  %s842_s3 = int_to_ptr.vmem [resolvable:$false] %s841_s3 }
  0x4c   : > { %s843_s24 = scalar_lea.vmem %s842_s3, 256  ;;  %p844_p0 = scmp.lt.s32.totalorder %s254_s29, %s842_s3 }
  0x4d   : > { %p839_p3 = pnand %p837_p1, %p1104_p2  ;;  %p845_p11 = scmp.lt.s32.totalorder %s843_s24, %s836_s30 }
  0x4f   : > { %p840_p9 = pneg %p839_p3  ;;  %p846_p12 = por %p845_p11, %p844_p0 }
  0x51   : > { %p847_p6 = pnand %p846_p12, %p840_p9 }
  0x53   : > { %850 = shalt.err (!%p847_p6)
}
  0x54   : > { %737 = dma.hbm_to_vmem [thread:$0]  (!%p1085_p13), %s1128_s27, 128, %s254_s29, %s243_s15  }
  0x55   : > { %s287_s19 = scalar_lea.hbm %s1293_s4, %s1080_s11  ;;  %s282_s18 = scalar_lea.vmem [#allocation7], %s1083_s12 }
  0x56   : > { %s289_s14 = sshll.u32 %s282_s18, 4  ;;  %s851_s23 = scalar_lea.hbm %s287_s19, 128  ;;  %s290_s14 = int_to_ptr.vmem [resolvable:$true] %s289_s14 }
  0x57   : > { %p852_p4 = scmp.ne.s32.totalorder %s287_s19, %s851_s23  ;;  %s856_s30 = scalar_lea.hbm %s1293_s4, 256 }
  0x58   : > { %p857_p6 = scmp.lt.s32.totalorder %s287_s19, %s1293_s4  ;;  %p858_p8 = scmp.lt.s32.totalorder %s856_s30, %s851_s23 }
  0x59   : > { %p854_p5 = pnand %p852_p4, %p1104_p2 }
  0x5a   : > { %p859_p10 = por %p858_p8, %p857_p6 }
  0x5b   : > { %p855_p7 = pneg %p854_p5 }
  0x5d   : > { %p860_p1 = pnand %p859_p10, %p855_p7 }
  0x5f   : > { %863 = shalt.err (!%p860_p1)
}
  0x60   : > { %s864_s27 = scalar_lea.vmem %s290_s14, 128  ;;  %s983_s29 = smov [#allocation7]  }
  0x61   : > { %p865_p3 = scmp.ne.s32.totalorder %s290_s14, %s864_s27  ;;  %s869_s15 = sshll.u32 %s983_s29, 4  ;;  %s870_s15 = int_to_ptr.vmem [resolvable:$false] %s869_s15 }
  0x62   : > { %s871_s16 = scalar_lea.vmem %s870_s15, 256  ;;  %p872_p11 = scmp.lt.s32.totalorder %s290_s14, %s870_s15 }
  0x63   : > { %p867_p9 = pnand %p865_p3, %p1104_p2  ;;  %p873_p12 = scmp.lt.s32.totalorder %s871_s16, %s864_s27 }
  0x65   : > { %p868_p0 = pneg %p867_p9  ;;  %p874_p4 = por %p873_p12, %p872_p11 }
  0x67   : > { %p875_p5 = pnand %p874_p4, %p868_p0 }
  0x69   : > { %878 = shalt.err (!%p875_p5)
}
  0x6a   : > { %743 = dma.hbm_to_vmem [thread:$0]  (!%p1085_p13), %s287_s19, 128, %s290_s14, %s1098_s20  }
  0x6b   : > { %s1176_s18 = scalar_lea.hbm %s1294_s5, %s1080_s11  ;;  %s300_s23 = scalar_lea.vmem [#allocation8], %s1083_s12 }
  0x6c   : > { %s307_s3 = sshll.u32 %s300_s23, 4  ;;  %s297_s24 = scalar_lea.sflag [#allocation9], %s1077_s10  ;;  %s308_s3 = int_to_ptr.vmem [resolvable:$true] %s307_s3 }
  0x6d   : > { %s879_s30 = scalar_lea.hbm %s1176_s18, 128  ;;  %s884_s20 = scalar_lea.hbm %s1294_s5, 256 }
  0x6e   : > { %p880_p7 = scmp.ne.s32.totalorder %s1176_s18, %s879_s30  ;;  %p885_p10 = scmp.lt.s32.totalorder %s1176_s18, %s1294_s5 }
  0x6f   : > { %p886_p1 = scmp.lt.s32.totalorder %s884_s20, %s879_s30 }
  0x70   : > { %p882_p6 = pnand %p880_p7, %p1104_p2 }
  0x71   : > { %p887_p3 = por %p886_p1, %p885_p10 }
  0x72   : > { %p883_p8 = pneg %p882_p6 }
  0x74   : > { %p888_p9 = pnand %p887_p3, %p883_p8 }
  0x76   : > { %891 = shalt.err (!%p888_p9)
}
  0x77   : > { %s892_s11 = scalar_lea.vmem %s308_s3, 128  ;;  %s984_s10 = smov [#allocation8]  }
  0x78   : > { %p893_p0 = scmp.ne.s32.totalorder %s308_s3, %s892_s11  ;;  %s897_s12 = sshll.u32 %s984_s10, 4  ;;  %s898_s12 = int_to_ptr.vmem [resolvable:$false] %s897_s12 }
  0x79   : > { %s899_s29 = scalar_lea.vmem %s898_s12, 256  ;;  %p900_p4 = scmp.lt.s32.totalorder %s308_s3, %s898_s12 }
  0x7a   : > { %p895_p11 = pnand %p893_p0, %p1104_p2  ;;  %p901_p5 = scmp.lt.s32.totalorder %s899_s29, %s892_s11 }
  0x7c   : > { %p896_p12 = pneg %p895_p11  ;;  %p902_p7 = por %p901_p5, %p900_p4 }
  0x7e   : > { %p903_p6 = pnand %p902_p7, %p896_p12 }
  0x80   : > { %906 = shalt.err (!%p903_p6)
}
  0x81   : > { %746 = dma.hbm_to_vmem [thread:$0]  (!%p1085_p13), %s1176_s18, 128, %s308_s3, %s297_s24  }
  0x82   : > { %p1319_p8 = scmp.ne.s32.totalorder %s1318_s9, 0 }
  0x83   : > { %s1199_s28 = sand.u32 (!%p1319_p8), 1, %s971_s22   ;;  %p1320_p2 = scmp.ne.s32.totalorder (!%p1319_p8), %s1309_s7, 0 }
  0x84   : > { %316 = sbr.rel (%p1319_p8) target bundleno = 690 (0x2b2), region = 44  ;;  %s1202_s15 = sshll.u32 (!%p1319_p8), %s1199_s28, 3 }
  0x85   : > { %s319_s16 = scalar_lea.sflag (!%p1319_p8), [#allocation3], %s1199_s28  ;;  %s322_s2 = scalar_lea.vmem (!%p1319_p8), [#allocation2], %s1202_s15 }
  0x89   : > { %950 = dma.done.wait (%p1320_p2), %s319_s16, 128  }
  0x8a   : > { %952 = vsyncadd (%p1320_p2), %s319_s16, 4294967168  ;;  %s327_s13 = sand.u32 1, %s1043_s25   ;;  %s331_s17 = scalar_lea.vmem [#allocation5], %s1202_s15 }
  0x8b   : > { %s328_s9 = scalar_lea.sflag [#allocation6], %s327_s13 }
  0x8c   : > { %954 = dma.done.wait (%p1320_p2), %s328_s9, 256  }
  0x8d   : > { %956 = vsyncadd (%p1320_p2), %s328_s9, 4294967040  ;;  %s340_s18 = scalar_lea.vmem [#allocation7], %s1202_s15  ;;  %s346_s23 = scalar_lea.sflag [#allocation9], %s1199_s28 }
  0x8e   : > { %s349_s3 = scalar_lea.vmem [#allocation8], %s1202_s15 }
  0x8f   : > { %958 = dma.done.wait (%p1320_p2), %s346_s23, 128  }
  0x90   : > { %960 = vsyncadd (%p1320_p2), %s346_s23, 4294967168  ;;  %p401_p13 = scmp.lt.s32.totalorder %s1043_s25, 1  ;;  %v985_v0 = vmov 0   ;;  %vm424_vm0 = vcmask 261120   ;;  %v453_v4 = vld [vmem:[%s322_s2] sm:$0xff]  ;;  %v410_v14 = vlaneseq  ;;  %v454_v15 = vld [vmem:[%s331_s17] sm:$0xff] }
  0x91   : > { %786 = vset.pattern.permute.xlu0 %v985_v0  ;;  %v458_v5 = vand.u32 2147483647, %v453_v4  ;;  %v455_v21 = vmax.f32 %v453_v4, 0.0  ;;  %v456_v22 = vmul.f32 %v454_v15, %v453_v4  ;;  %v487_v29 = vld [vmem:[%s340_s18] sm:$0xff]  ;;  %v488_v30 = vld [vmem:[%s349_s3] sm:$0xff]  ;;  %vm472_vm3 = vcmask 130048  }
  0x92   : > { %s402_s24 = scalar_select %p401_p13, %s1043_s25, 1  ;;  %v1234_v18 = vand.u32 127, %v410_v14  ;;  %v489_v34 = vsub.f32 %v487_v29, %v488_v30  ;;  %vm491_vm4 = vcmask 523264   ;;  %v411_v38 = vshrl.u32 %v410_v14, 7 }
  0x93   : > { %v459_v6 = vsub.f32 0.0, %v458_v5  ;;  %v457_v25 = vsub.f32 %v455_v21, %v456_v22  ;;  %s713_s11 = sshll.u32 %s1043_s25, 3  ;;  %vm442_vm6 = vcmask 7168   ;;  %s715_s29 = sshll.u32 %s1043_s25, 7 }
  0x94   : > { %s711_s30 = sshll.u32 %s402_s24, 3  ;;  %v490_v36 = vmul.f32 %v489_v34, %v489_v34  ;;  %v412_v39 = vstv %s713_s11  ;;  %vm506_vm7 = vcmp.eq.s32.totalorder %v411_v38, 0  ;;  %vm511_vm8 = vcmp.eq.s32.totalorder %v1234_v18, 2  ;;  %s400_s2 = scalar_lea.vmem [#allocation10], %s1202_s15 }
  0x95   : > { %s408_s20 = scalar_lea.vmem %s1290_s1, %s711_s30  ;;  %s404_s7 = scalar_lea.vmem %s1289_s0, %s711_s30  ;;  %v460_v7 = vmul.f32 1.442695, %v459_v6  ;;  %v413_v41 = vadd.s32 %v412_v39, %v411_v38  ;;  %vm509_vm9 = vcmp.eq.s32.totalorder %v1234_v18, 1  ;;  %vm507_vm10 = vcmp.eq.s32.totalorder %v1234_v18, 0  ;;  %vm512_vm11 = vmand %vm506_vm7, %vm511_vm8 }
  0x96   : > { %v415_v1 = vld [vmem:[%s408_s20] sm:$0xff]  ;;  %v492_v37 = vsel %vm491_vm4, %v490_v36, 0.0  ;;  %vm510_vm12 = vmand %vm506_vm7, %vm509_vm9  ;;  %s534_s13 = sshll.u32 %s400_s2, 4  ;;  %s1252_s18 = scalar_lea.hbm %s1295_s6, %s715_s29  ;;  %s535_s13 = int_to_ptr.vmem [resolvable:$true] %s534_s13 }
  0x97   : > { %v428_v2 = vsel %vm424_vm0, %v415_v1, -inf  ;;  %v416_v3 = vld [vmem:[%s404_s7] sm:$0xff]  ;;  %787 = vpow2.f32 %v460_v7  ;;  %vm414_vm5 = vcmp.lt.s32.totalorder %v413_v41, 12  ;;  %vm508_vm13 = vmand %vm506_vm7, %vm507_vm10  ;;  %s521_s25 = scalar_lea.sflag [#allocation4], %s1199_s28  ;;  %s907_s23 = scalar_lea.vmem %s535_s13, 128 }
  0x98   : > { %429 = vmax.xlane.f32.xlu0 %v428_v2  ;;  %p908_p10 = scmp.ne.s32.totalorder %s535_s13, %s907_s23  ;;  %p1321_p1 = scmp.ne.s32.totalorder %s1310_s8, 0 }
  0x99   : > { %s986_s15 = smov [#allocation10]  }
  0x9a   : > { %p909_p3 = pnand %p908_p10, %p1321_p1  ;;  %s911_s3 = sshll.u32 %s986_s15, 4  ;;  %s912_s3 = int_to_ptr.vmem [resolvable:$false] %s911_s3 }
  0x9b   : > { %s913_s24 = scalar_lea.vmem %s912_s3, 256  ;;  %p914_p0 = scmp.lt.s32.totalorder %s535_s13, %s912_s3 }
  0x9c   : > { %p910_p9 = pneg %p909_p3  ;;  %p915_p11 = scmp.lt.s32.totalorder %s913_s24, %s907_s23 }
  0x9e   : > { %p916_p12 = por %p915_p11, %p914_p0 }
  0xa0   : > { %p917_p4 = pnand %p916_p12, %p910_p9 }
  0xa4   : > { %v788_v8 = vpop.eup %787 }
  0xa5   : > { %v462_v9 = vadd.f32 1.0, %v788_v8  ;;  %v465_v13 = vmul.f32 -0.5, %v788_v8  ;;  %v468_v19 = vand.u32 2147483647, %v788_v8 }
  0xa7   : > { %789 = vlog2.f32 %v462_v9  ;;  %v466_v16 = vadd.f32 1.0, %v465_v13  ;;  %vm469_vm2 = vcmp.lt.f32.partialorder %v468_v19, 0.0004427343 }
  0xa9   : > { %v467_v24 = vmul.f32 %v788_v8, %v466_v16 }
  0xae   : > { %420 = vperm.xlu0 %786, %v416_v3  }
  0xb4   : > { %v790_v17 = vpop.eup %789 }
  0xb5   : > { %v464_v23 = vmul.f32 0.6931472, %v790_v17 }
  0xb7   : > { %v470_v28 = vsel %vm469_vm2, %v467_v24, %v464_v23 }
  0xb8   : > { %v471_v33 = vadd.f32 %v470_v28, %v457_v25 }
  0xba   : > { %v473_v35 = vsel %vm472_vm3, %v471_v33, 0.0 }
 0x121   : > { %v430_v10 = vpop.xlane.xlu0 %429 }
 0x122   : > { %v431_v11 = vsub.f32 %v415_v1, %v430_v10 }
 0x124   : > { %v432_v12 = vmul.f32 1.442695, %v431_v11 }
 0x126   : > { %791 = vpow2.f32 %v432_v12 }
 0x129   : > { %v421_v20 = vpop.permute.xlu0 %420 }
 0x12a   : > { %vm422_vm1 = vcmp.eq.s32.totalorder %v1234_v18, %v421_v20 }
 0x12b   : > { %v423_v27 = vsel %vm422_vm1, %v415_v1, 0.0 }
 0x12c   : > { %v425_v32 = vsel %vm424_vm0, %v423_v27, 0.0 }
 0x133   : > { %v792_v26 = vpop.eup %791 }
 0x134   : > { %v434_v31 = vsel %vm424_vm0, %v792_v26, 0.0 }
 0x135   : > { %435 = vadd.xlane.f32.xlu1 %v434_v31 }
 0x139   : > { %426 = vadd.xlane.f32.xlu1 %v425_v32 }
 0x13d   : > { %474 = vadd.xlane.f32.xlu1 %v473_v35 }
 0x141   : > { %493 = vadd.xlane.f32.xlu1 %v492_v37 }
 0x1be   : > { %v436_v40 = vpop.xlane.xlu1 %435 }
 0x1bf   : > { %793 = vlog2.f32 %v436_v40 }
 0x1c2   : > { %v427_v42 = vpop.xlane.xlu1 %426 }
 0x1c6   : > { %v475_v43 = vpop.xlane.xlu1 %474 }
 0x1c7   : > { %v476_v44 = vsel %vm414_vm5, %v475_v43, 0.0 }
 0x1c8   : > { %v477_v45 = vsel %vm442_vm6, %v476_v44, 0.0 }
 0x1c9   : > { %478 = vadd.xlane.f32.xlu1 %v477_v45 }
 0x1ca   : > { %v494_v49 = vpop.xlane.xlu1 %493 }
 0x1cb   : > { %v495_v52 = vsel %vm414_vm5, %v494_v49, 0.0 }
 0x1cc   : > { %v794_v46 = vpop.eup %793  ;;  %v496_v54 = vsel %vm442_vm6, %v495_v52, 0.0 }
 0x1cd   : > { %v438_v47 = vmul.f32 0.6931472, %v794_v46 }
 0x1cf   : > { %v439_v48 = vadd.f32 %v438_v47, %v430_v10 }
 0x1d1   : > { %v440_v50 = vsub.f32 %v439_v48, %v427_v42 }
 0x1d3   : > { %v441_v51 = vsel %vm414_vm5, %v440_v50, 0.0 }
 0x1d4   : > { %v443_v53 = vsel %vm442_vm6, %v441_v51, 0.0 }
 0x1d5   : > { %444 = vadd.xlane.f32.xlu1 %v443_v53 }
 0x1d9   : > { %497 = vadd.xlane.f32.xlu1 %v496_v54 }
 0x252   : > { %v479_v55 = vpop.xlane.xlu1 %478 }
 0x253   : > { %v480_v56 = vrot.slane %v479_v55, 4 }
 0x255   : > { %v481_v57 = vadd.f32 %v480_v56, %v479_v55 }
 0x257   : > { %v482_v58 = vrot.slane %v481_v57, 2 }
 0x259   : > { %v483_v63 = vadd.f32 %v482_v58, %v481_v57 }
 0x25b   : > { %v484_v4 = vrot.slane %v483_v63, 1 }
 0x25d   : > { %v485_v9 = vadd.f32 %v484_v4, %v483_v63 }
 0x25e   : > { %v445_v59 = vpop.xlane.xlu1 %444 }
 0x25f   : > { %v446_v60 = vrot.slane %v445_v59, 4 }
 0x261   : > { %v447_v61 = vadd.f32 %v446_v60, %v445_v59 }
 0x262   : > { %v498_v62 = vpop.xlane.xlu1 %497 }
 0x263   : > { %v448_v0 = vrot.slane %v447_v61, 2  ;;  %v499_v1 = vrot.slane %v498_v62, 4 }
 0x265   : > { %v500_v2 = vadd.f32 %v499_v1, %v498_v62  ;;  %v449_v3 = vadd.f32 %v448_v0, %v447_v61 }
 0x267   : > { %v501_v5 = vrot.slane %v500_v2, 2  ;;  %v450_v6 = vrot.slane %v449_v3, 1 }
 0x269   : > { %v502_v7 = vadd.f32 %v501_v5, %v500_v2  ;;  %v451_v8 = vadd.f32 %v450_v6, %v449_v3 }
 0x26b   : > { %718 = vpush %v451_v8  ;;  %v503_v10 = vrot.slane %v502_v7, 1 }
 0x26c   : > { %720 = vpush %v485_v9 }
 0x26d   : > { %v504_v11 = vadd.f32 %v503_v10, %v502_v7 }
 0x26f   : > { %722 = vpush %v504_v11 }
 0x29c   : > { %s719_s10 = spop %718 }
 0x29d   : > { %s721_s12 = spop %720  ;;  %v517_v15 = vstv %s719_s10 }
 0x29e   : > { %v515_v13 = vstv %s721_s12 }
 0x2a0   : > { %s723_s16 = spop %722 }
 0x2a1   : > { %v513_v12 = vstv %s723_s16 }
 0x2a2   : > { %v514_v14 = vsel %vm512_vm11, %v513_v12, 0.0 }
 0x2a3   : > { %v516_v16 = vsel %vm510_vm12, %v515_v13, %v514_v14 }
 0x2a4   : > { %v518_v17 = vsel %vm508_vm13, %v517_v15, %v516_v16 }
 0x2a5   : > { %519 = vst [vmem:[%s400_s2] sm:$0xff] %v518_v17 }
 0x2a6   : > { %920 = shalt.err (!%p917_p4)
}
 0x2a7   : > { %s921_s30 = scalar_lea.hbm %s1252_s18, 128  ;;  %s925_s27 = scalar_lea.hbm %s1295_s6, 256 }
 0x2a8   : > { %p922_p5 = scmp.ne.s32.totalorder %s1252_s18, %s921_s30  ;;  %p926_p8 = scmp.lt.s32.totalorder %s1252_s18, %s1295_s6 }
 0x2a9   : > { %p927_p2 = scmp.lt.s32.totalorder %s925_s27, %s921_s30 }
 0x2aa   : > { %p923_p7 = pnand %p922_p5, %p1321_p1 }
 0x2ab   : > { %p928_p13 = por %p927_p2, %p926_p8 }
 0x2ac   : > { %p924_p6 = pneg %p923_p7 }
 0x2ae   : > { %p929_p10 = pnand %p928_p13, %p924_p6 }
 0x2b0   : > { %932 = shalt.err (!%p929_p10)
}
 0x2b1   : > { %732 = dma.vmem_to_hbm [thread:$0]  (%p1321_p1), %s535_s13, 128, %s1252_s18, %s521_s25  }
 0x2b2 PF: > { %s1322_s14 = sld [smem:[#allocation19_spill]]  ;;  %s546_s11 = sand.u32 1, %s967_s21  }
 0x2b3   : > { %s1323_s7 = sld [smem:[#allocation16_spill]]  ;;  %s547_s10 = scalar_lea.sflag [#allocation4], %s546_s11 }
 0x2b8   : > { %p1324_p3 = scmp.ne.s32.totalorder %s1322_s14, 0 }
 0x2b9   : > { %p1325_p9 = scmp.ge.s32.totalorder %s1323_s7, 2 }
 0x2bb   : > { %p748_p0 = pnand %p1325_p9, %p1324_p3 }
 0x2bd   : > { %p749_p11 = pneg %p748_p0 }
 0x2bf   : > { %962 = dma.done.wait (%p749_p11), %s547_s10, 128  }
 0x2c0   : > { %964 = vsyncadd (%p749_p11), %s547_s10, 4294967168  ;;  %s1326_s24 = sld [smem:[#allocation17_spill]]  ;;  %s1329_s21 = smov %s971_s22 }
 0x2c1   : > { %s1327_s12 = sld [smem:[#allocation15_spill]] }
 0x2c2   : > { %s1328_s23 = sld [smem:[#allocation18_spill]] }
 0x2c6   : > { %p25_p12 = scmp.ge.s32.totalorder %s1326_s24, 4  }
 0x2c7   : > { %s1330_s22 = smov %s1327_s12 }
 0x2c8   :  { %27 = sbr.rel (!%p25_p12) target bundleno = 12 (0xc), region = 132 }
 0x2cd   :  { %552 = vsyncpa [#allocation3], 1 }
 0x2ce   :  { %554 = vsyncpa [#allocation3 + $0x1], 1 }
 0x2cf   :  { %555 = vsyncpa [#allocation6], 1 }
 0x2d0   :  { %557 = vsyncpa [#allocation6 + $0x1], 1 }
 0x2d1   :  { %558 = vsyncpa [#allocation9], 1 }
 0x2d2   :  { %560 = vsyncpa [#allocation9 + $0x1], 1 }
 0x2d3   :  { %561 = vsyncpa [#allocation4], 1 }
 0x2d4   :  { %563 = vsyncpa [#allocation4 + $0x1], 1 }

</bundles_post_ra>
